<compile_context>
chip_gen: v5e
topology: v5e:2x2
jax: 0.10.0
libtpu: 0.0.40
codegen_flags: <defaults>
</compile_context>

<pallas_src>
import jax
import jax.numpy as jnp
from jax.experimental import pallas as pl
from jax.experimental.pallas import tpu as pltpu


_SUBLANE = 8       # sublane tile height
_TM_MAX = 1024     # max batch rows per grid step


def _round_up(x, m):
    return ((x + m - 1) // m) * m


def _dqn_kernel(x_ref, w1_ref, b1_ref, w2_ref, b2_ref, w3_ref, b3_ref, o_ref):
    """Fused 3-layer MLP forward on one (TM, state) batch tile."""
    x = x_ref[...]
    h1 = jnp.dot(x, w1_ref[...], preferred_element_type=jnp.float32) + b1_ref[...]
    h1 = jnp.maximum(h1, 0.0)
    h2 = jnp.dot(h1, w2_ref[...], preferred_element_type=jnp.float32) + b2_ref[...]
    h2 = jnp.maximum(h2, 0.0)
    out = jnp.dot(h2, w3_ref[...], preferred_element_type=jnp.float32) + b3_ref[...]
    o_ref[...] = out.astype(o_ref.dtype)


@jax.jit
def dqn_forward(x, w1, b1, w2, b2, w3, b3):
    batch, state_size = x.shape
    h1_size = w1.shape[1]
    h2_size = w2.shape[1]
    action_size = w3.shape[1]

    # --- batch tiling (rows only; feature dims stay unpadded in HBM) -------------
    batch_p8 = max(_round_up(batch, _SUBLANE), _SUBLANE)
    if batch_p8 > _SUBLANE:
        # Split into >= 2 grid steps so "parallel" shards across both v7x TensorCores.
        tm = min(_TM_MAX, _round_up(pl.cdiv(batch_p8, 2), _SUBLANE))
    else:
        tm = batch_p8
    batch_p = _round_up(batch_p8, tm)

    x_in = x if batch_p == batch else jnp.pad(x, ((0, batch_p - batch), (0, 0)))

    grid = (batch_p // tm,)

    # Weights/biases: constant index_map -> fetched once, VMEM-resident across steps.
    const2d = lambda shape: pl.BlockSpec(shape, lambda i: (0, 0))

    flops = 2 * batch_p * (state_size * h1_size + h1_size * h2_size
                           + h2_size * action_size)
    bytes_accessed = 4 * (batch_p * state_size + batch_p * action_size
                          + state_size * h1_size + h1_size * h2_size
                          + h2_size * action_size
                          + h1_size + h2_size + action_size)

    out_p = pl.pallas_call(
        _dqn_kernel,
        out_shape=jax.ShapeDtypeStruct((batch_p, action_size), x.dtype),
        grid=grid,
        in_specs=[
            pl.BlockSpec((tm, state_size), lambda i: (i, 0)),   # x tile (pipelined)
            const2d((state_size, h1_size)),                     # W1
            const2d((1, h1_size)),                              # b1
            const2d((h1_size, h2_size)),                        # W2
            const2d((1, h2_size)),                              # b2
            const2d((h2_size, action_size)),                    # W3
            const2d((1, action_size)),                          # b3
        ],
        out_specs=pl.BlockSpec((tm, action_size), lambda i: (i, 0)),
        compiler_params=pltpu.CompilerParams(
            dimension_semantics=("parallel",),
        ),
        cost_estimate=pl.CostEstimate(
            flops=flops, transcendentals=0, bytes_accessed=bytes_accessed),
    )(x_in, w1, b1, w2, b2, w3, b3)

    return out_p if batch_p == batch else out_p[:batch]


def init_dqn_params(key, state_size, action_size, hidden_sizes=(64, 64)):
    """Deterministic synthetic init (uniform, ~PyTorch Linear default scale)."""
    params = []
    in_dim = state_size
    dims = list(hidden_sizes) + [action_size]
    for out_dim in dims:
        key, kw, kb = jax.random.split(key, 3)
        bound = 1.0 / jnp.sqrt(in_dim)
        w = jax.random.uniform(kw, (in_dim, out_dim), jnp.float32, -bound, bound)
        b = jax.random.uniform(kb, (1, out_dim), jnp.float32, -bound, bound)
        params.extend([w, b])
        in_dim = out_dim
    return params


def reference_forward(x, w1, b1, w2, b2, w3, b3):
    h1 = jnp.maximum(x @ w1 + b1, 0.0)
    h2 = jnp.maximum(h1 @ w2 + b2, 0.0)
    return h2 @ w3 + b3


if __name__ == "__main__":
    key = jax.random.PRNGKey(0)
    batch, state_size, action_size = 2, 8, 4
    hidden_sizes = (64, 64)

    key, kx = jax.random.split(key)
    x = jax.random.normal(kx, (batch, state_size), jnp.float32)

    w1, b1, w2, b2, w3, b3 = init_dqn_params(key, state_size, action_size, hidden_sizes)

    out = dqn_forward(x, w1, b1, w2, b2, w3, b3)
    out = jax.block_until_ready(out)

    ref = reference_forward(x, w1, b1, w2, b2, w3, b3)
    assert out.shape == (batch, action_size)
    assert jnp.allclose(out, ref, atol=1e-5, rtol=1e-5), "mismatch vs reference"

    # Larger, tile-spanning batch (exercises the multi-step grid + row-pad path).
    key, kx2 = jax.random.split(key)
    x_big = jax.random.normal(kx2, (1000, state_size), jnp.float32)
    out_big = jax.block_until_ready(dqn_forward(x_big, w1, b1, w2, b2, w3, b3))
    ref_big = reference_forward(x_big, w1, b1, w2, b2, w3, b3)
    assert out_big.shape == (1000, action_size)
    assert jnp.allclose(out_big, ref_big, atol=1e-4, rtol=1e-4), "mismatch vs reference (big batch)"

    print("KERNEL_OK")
</pallas_src>

<mosaic_0001>
module attributes {stable_mosaic.version = 11 : i64} {
  func.func @_dqn_kernel(%arg0: i32, %arg1: memref<8x8xf32, #tpu.memory_space<vmem>>, %arg2: memref<8x64xf32, #tpu.memory_space<vmem>>, %arg3: memref<1x64xf32, #tpu.memory_space<vmem>>, %arg4: memref<64x64xf32, #tpu.memory_space<vmem>>, %arg5: memref<1x64xf32, #tpu.memory_space<vmem>>, %arg6: memref<64x4xf32, #tpu.memory_space<vmem>>, %arg7: memref<1x4xf32, #tpu.memory_space<vmem>>, %arg8: memref<8x4xf32, #tpu.memory_space<vmem>>) attributes {dimension_semantics = [#tpu.dimension_semantics<parallel>], iteration_bounds = array<i64: 1>, scalar_prefetch = 0 : i64, scratch_operands = 0 : i64, tpu.core_type = #tpu.core_type<tc>, window_params = [{transform_indices = @transform_0, window_bounds = array<i64: 8, 8>}, {pipeline_mode = #tpu.pipeline_mode<synchronous>, transform_indices = @transform_1, window_bounds = array<i64: 8, 64>}, {pipeline_mode = #tpu.pipeline_mode<synchronous>, transform_indices = @transform_2, window_bounds = array<i64: 1, 64>}, {pipeline_mode = #tpu.pipeline_mode<synchronous>, transform_indices = @transform_3, window_bounds = array<i64: 64, 64>}, {pipeline_mode = #tpu.pipeline_mode<synchronous>, transform_indices = @transform_4, window_bounds = array<i64: 1, 64>}, {pipeline_mode = #tpu.pipeline_mode<synchronous>, transform_indices = @transform_5, window_bounds = array<i64: 64, 4>}, {pipeline_mode = #tpu.pipeline_mode<synchronous>, transform_indices = @transform_6, window_bounds = array<i64: 1, 4>}, {transform_indices = @transform_7, window_bounds = array<i64: 8, 4>}]} {
    %c0 = arith.constant 0 : index
    %c0_0 = arith.constant 0 : index
    %0 = vector.load %arg1[%c0, %c0_0] : memref<8x8xf32, #tpu.memory_space<vmem>>, vector<8x8xf32>
    %c0_1 = arith.constant 0 : index
    %c0_2 = arith.constant 0 : index
    %1 = vector.load %arg2[%c0_1, %c0_2] : memref<8x64xf32, #tpu.memory_space<vmem>>, vector<8x64xf32>
    %cst = arith.constant dense<0.000000e+00> : vector<8x64xf32>
    %2 = tpu.matmul %0, %1, %cst {dimension_numbers = #tpu.dot_dimension_numbers<[1], [0], [0], [1], [0, 0, 1, 1], [], []>} : vector<8x8xf32>, vector<8x64xf32>, vector<8x64xf32> -> vector<8x64xf32>
    %c0_3 = arith.constant 0 : index
    %c0_4 = arith.constant 0 : index
    %3 = vector.load %arg3[%c0_3, %c0_4] : memref<1x64xf32, #tpu.memory_space<vmem>>, vector<1x64xf32>
    %4 = vector.broadcast %3 : vector<1x64xf32> to vector<8x64xf32>
    %5 = arith.addf %2, %4 : vector<8x64xf32>
    %cst_5 = arith.constant 0.000000e+00 : f32
    %6 = vector.broadcast %cst_5 : f32 to vector<8x64xf32>
    %7 = arith.maximumf %5, %6 : vector<8x64xf32>
    %c0_6 = arith.constant 0 : index
    %c0_7 = arith.constant 0 : index
    %8 = vector.load %arg4[%c0_6, %c0_7] : memref<64x64xf32, #tpu.memory_space<vmem>>, vector<64x64xf32>
    %cst_8 = arith.constant dense<0.000000e+00> : vector<8x64xf32>
    %9 = tpu.matmul %7, %8, %cst_8 {dimension_numbers = #tpu.dot_dimension_numbers<[1], [0], [0], [1], [0, 0, 1, 1], [], []>} : vector<8x64xf32>, vector<64x64xf32>, vector<8x64xf32> -> vector<8x64xf32>
    %c0_9 = arith.constant 0 : index
    %c0_10 = arith.constant 0 : index
    %10 = vector.load %arg5[%c0_9, %c0_10] : memref<1x64xf32, #tpu.memory_space<vmem>>, vector<1x64xf32>
    %11 = vector.broadcast %10 : vector<1x64xf32> to vector<8x64xf32>
    %12 = arith.addf %9, %11 : vector<8x64xf32>
    %cst_11 = arith.constant 0.000000e+00 : f32
    %13 = vector.broadcast %cst_11 : f32 to vector<8x64xf32>
    %14 = arith.maximumf %12, %13 : vector<8x64xf32>
    %c0_12 = arith.constant 0 : index
    %c0_13 = arith.constant 0 : index
    %15 = vector.load %arg6[%c0_12, %c0_13] : memref<64x4xf32, #tpu.memory_space<vmem>>, vector<64x4xf32>
    %cst_14 = arith.constant dense<0.000000e+00> : vector<8x4xf32>
    %16 = tpu.matmul %14, %15, %cst_14 {dimension_numbers = #tpu.dot_dimension_numbers<[1], [0], [0], [1], [0, 0, 1, 1], [], []>} : vector<8x64xf32>, vector<64x4xf32>, vector<8x4xf32> -> vector<8x4xf32>
    %c0_15 = arith.constant 0 : index
    %c0_16 = arith.constant 0 : index
    %17 = vector.load %arg7[%c0_15, %c0_16] : memref<1x4xf32, #tpu.memory_space<vmem>>, vector<1x4xf32>
    %18 = vector.broadcast %17 : vector<1x4xf32> to vector<8x4xf32>
    %19 = arith.addf %16, %18 : vector<8x4xf32>
    %c0_17 = arith.constant 0 : index
    %c0_18 = arith.constant 0 : index
    %20 = vector.load %arg8[%c0_17, %c0_18] : memref<8x4xf32, #tpu.memory_space<vmem>>, vector<8x4xf32>
    tpu.vector_store %arg8[%c0_17, %c0_18], %19 {strides = array<i32>} : memref<8x4xf32, #tpu.memory_space<vmem>>, vector<8x4xf32>,
    return
  }
  func.func @transform_0(%arg0: i32) -> (i32, i32) {
    %c0_i32 = arith.constant 0 : i32
    %c0_i32_0 = arith.constant 0 : i32
    return %arg0, %c0_i32 : i32, i32
  }
  func.func @transform_1(%arg0: i32) -> (i32, i32) {
    %c0_i32 = arith.constant 0 : i32
    %c0_i32_0 = arith.constant 0 : i32
    %c0_i32_1 = arith.constant 0 : i32
    return %c0_i32, %c0_i32_0 : i32, i32
  }
  func.func @transform_2(%arg0: i32) -> (i32, i32) {
    %c0_i32 = arith.constant 0 : i32
    %c0_i32_0 = arith.constant 0 : i32
    %c0_i32_1 = arith.constant 0 : i32
    return %c0_i32, %c0_i32_0 : i32, i32
  }
  func.func @transform_3(%arg0: i32) -> (i32, i32) {
    %c0_i32 = arith.constant 0 : i32
    %c0_i32_0 = arith.constant 0 : i32
    %c0_i32_1 = arith.constant 0 : i32
    return %c0_i32, %c0_i32_0 : i32, i32
  }
  func.func @transform_4(%arg0: i32) -> (i32, i32) {
    %c0_i32 = arith.constant 0 : i32
    %c0_i32_0 = arith.constant 0 : i32
    %c0_i32_1 = arith.constant 0 : i32
    return %c0_i32, %c0_i32_0 : i32, i32
  }
  func.func @transform_5(%arg0: i32) -> (i32, i32) {
    %c0_i32 = arith.constant 0 : i32
    %c0_i32_0 = arith.constant 0 : i32
    %c0_i32_1 = arith.constant 0 : i32
    return %c0_i32, %c0_i32_0 : i32, i32
  }
  func.func @transform_6(%arg0: i32) -> (i32, i32) {
    %c0_i32 = arith.constant 0 : i32
    %c0_i32_0 = arith.constant 0 : i32
    %c0_i32_1 = arith.constant 0 : i32
    return %c0_i32, %c0_i32_0 : i32, i32
  }
  func.func @transform_7(%arg0: i32) -> (i32, i32) {
    %c0_i32 = arith.constant 0 : i32
    %c0_i32_0 = arith.constant 0 : i32
    return %arg0, %c0_i32 : i32, i32
  }
}

</mosaic_0001>

<bundles_post_ra>
// kernel: dqn_forward.1
= control target key start
LH: loop header
LB: loop body
LE: loop exit
PB: predicated region body
PF: predicated region fallthrough
CT: control target
= control target key end

     0   :  { %vm32_vm0 = vcmask 64512   ;;  %vm69_vm1 = vcmask 523264   ;;  %vm129_vm2 = vcmask 31744   ;;  %s247_s1 = inlined_call_operand.vmem [shape: f32[8,64], index: 1, kind: input, shape index: {}]   ;;  %s248_s0 = inlined_call_operand.vmem [shape: f32[8,8], index: 0, kind: input, shape index: {}]   ;;  %s249_s3 = inlined_call_operand.vmem [shape: f32[64,64], index: 3, kind: input, shape index: {}]   ;;  %s250_s2 = inlined_call_operand.vmem [shape: f32[1,64], index: 2, kind: input, shape index: {}]   ;;  %s251_s4 = inlined_call_operand.vmem [shape: f32[1,64], index: 4, kind: input, shape index: {}]   ;;  %s252_s5 = inlined_call_operand.vmem [shape: f32[64,4], index: 5, kind: input, shape index: {}]   ;;  %s253_s6 = inlined_call_operand.vmem [shape: f32[1,4], index: 6, kind: input, shape index: {}]   ;;  %s254_s7 = inlined_call_operand.vmem [shape: f32[8,4], index: 7, kind: output, shape index: {}]  }
   0x1   :  { %v27_v0 = vld [vmem:[%s247_s1] sm:$0xff]  ;;  %v64_v2 = vld [vmem:[%s249_s3 + $0x38] sm:$0xff]  ;;  %v63_v3 = vld [vmem:[%s249_s3 + $0x30] sm:$0xff] }
   0x2   :  { %v26_v1 = vld [vmem:[%s248_s0] sm:$0xff]  ;;  %51 = vmatpush.msra.mxu0 %v27_v0  ;;  %81 = vmatpush.msra.mxu1 %v64_v2  ;;  %v62_v4 = vld [vmem:[%s249_s3 + $0x28] sm:$0xff]  ;;  %v60_v6 = vld [vmem:[%s249_s3 + $0x18] sm:$0xff] }
   0x3   :  { %135 = vmatmul.msk.f32.vlgmr.msra.gmra.mxu0 %vm32_vm0, %v26_v1  ;;  %v61_v5 = vld [vmem:[%s249_s3 + $0x20] sm:$0xff]  ;;  %v59_v7 = vld [vmem:[%s249_s3 + $0x10] sm:$0xff]  ;;  %v58_v8 = vld [vmem:[%s249_s3 + $0x8] sm:$0xff] }
   0x4   :  { %82 = vmatpush.msra.mxu1 %v63_v3  ;;  %v57_v9 = vld [vmem:[%s249_s3] sm:$0xff]  ;;  %v101_v10 = vld [vmem:[%s252_s5 + $0x38] sm:$0xff]  ;;  %v100_v11 = vld [vmem:[%s252_s5 + $0x30] sm:$0xff] }
   0x5   :  { %117 = vmatpush.msra.mxu2 %v101_v10  ;;  %v99_v12 = vld [vmem:[%s252_s5 + $0x28] sm:$0xff]  ;;  %v98_v13 = vld [vmem:[%s252_s5 + $0x20] sm:$0xff]  ;;  %v97_v14 = vld [vmem:[%s252_s5 + $0x18] sm:$0xff] }
   0x6   :  { %83 = vmatpush.msra.mxu1 %v62_v4  ;;  %v138_v15 = vld [vmem:[%s250_s2] ss:$0 sm:$0xff]  ;;  %v96_v19 = vld [vmem:[%s252_s5 + $0x10] sm:$0xff]  ;;  %v95_v20 = vld [vmem:[%s252_s5 + $0x8] sm:$0xff] }
   0x7   :  { %118 = vmatpush.msra.mxu2 %v100_v11  ;;  %v94_v21 = vld [vmem:[%s252_s5] sm:$0xff] }
   0x8   :  { %84 = vmatpush.msra.mxu1 %v61_v5  ;;  %v139_v22 = vld [vmem:[%s251_s4] ss:$0 sm:$0xff] }
   0x9   :  { %119 = vmatpush.msra.mxu2 %v99_v12  ;;  %v140_v26 = vld [vmem:[%s253_s6] ss:$0 sm:$0xff] }
   0xa   :  { %85 = vmatpush.msra.mxu1 %v60_v6 }
   0xb   :  { %120 = vmatpush.msra.mxu2 %v98_v13 }
   0xc   :  { %86 = vmatpush.msra.mxu1 %v59_v7 }
   0xd   :  { %121 = vmatpush.msra.mxu2 %v97_v14 }
   0xe   :  { %87 = vmatpush.msra.mxu1 %v58_v8 }
   0xf   :  { %122 = vmatpush.msra.mxu2 %v96_v19 }
  0x10   :  { %88 = vmatpush.msra.mxu1 %v57_v9 }
  0x11   :  { %123 = vmatpush.msra.mxu2 %v95_v20 }
  0x13   :  { %124 = vmatpush.msra.mxu2 %v94_v21 }
  0x80   :  { %v53_v16 = vpop.f32.mrf.mxu0 }
  0x81   :  { %v54_v17 = vadd.f32 %v138_v15, %v53_v16 }
  0x83   :  { %v56_v18 = vmax.f32 %v54_v17, 0.0 }
  0x85   :  { %136 = vmatmul.msk.f32.vlgmr.msra.gmra.mxu1 %vm69_vm1, %v56_v18 }
 0x102   :  { %v90_v23 = vpop.f32.mrf.mxu1 }
 0x103   :  { %v91_v24 = vadd.f32 %v139_v22, %v90_v23 }
 0x105   :  { %v93_v25 = vmax.f32 %v91_v24, 0.0 }
 0x107   :  { %137 = vmatmul.msk.f32.vlgmr.msra.gmra.mxu2 %vm69_vm1, %v93_v25 }
 0x18a   :  { %v126_v27 = vpop.f32.mrf.mxu2 }
 0x18b   :  { %v127_v28 = vadd.f32 %v140_v26, %v126_v27 }
 0x18d   :  { %130 = vst.msk [vmem:[%s254_s7] sm:$0xff] %vm129_vm2, %v127_v28 }

</bundles_post_ra>
